<compile_context>
chip_gen: v7x
topology: tpu7x:2x2x1
jax: 0.10.0
libtpu: 0.0.40
codegen_flags: <defaults>
</compile_context>

<pallas_src>
import jax
import jax.numpy as jnp
from jax.experimental import pallas as pl
from jax.experimental.pallas import tpu as pltpu

C_OUT = 3
H = 16
W = 16
HP = H + 2          # 18 (padding=1 on each side)
WP = W + 2          # 18
NPIX = HP * WP      # 324
NLANE = 384         # next multiple of 128 -> fully unmasked lane tiles
SQRT_HALF = 0.7071067811865476


def conv1x1_gelu_kernel(x_ref, wb_ref, o_ref):
    """Packed pointwise 1x1 conv + residual-GELU epilogue.

    x_ref  : (3, 384)  zero-padded input plane, pre-broadcast per channel, VMEM
    wb_ref : (3, 2)    column 0 = conv weight, column 1 = conv bias, VMEM
    o_ref  : (3, 384)  output (channels x flattened padded plane), VMEM
    """
    x = x_ref[...]                       # (3, 384) — no sublane broadcast needed
    w = wb_ref[:, 0:1]                   # (3, 1)
    b = wb_ref[:, 1:2]                   # (3, 1)
    # 1x1 conv for all 3 output channels: one broadcasted FMA on the VALU.
    v1 = x * w + b
    # v1 + GELU(v1) == v1 * (1.5 + 0.5 * erf(v1 / sqrt(2)))   (exact erf GELU)
    o_ref[...] = v1 * (1.5 + 0.5 * jax.lax.erf(v1 * SQRT_HALF))


def model_forward(x, w, b):
    """x: (1, 1, 16, 16) NCHW, w: (3, 1, 1, 1), b: (3,) -> (1, 3, 18, 18)."""
    assert x.shape == (1, 1, H, W), x.shape
    assert w.shape == (C_OUT, 1, 1, 1), w.shape
    assert b.shape == (C_OUT,), b.shape

    # padding=1 of the 1x1 conv + lane-pad to 384 + per-channel broadcast:
    # all one small XLA fusion feeding a lane-dense (3, 384) slab to the kernel.
    xp = jnp.pad(x[0, 0], ((1, 1), (1, 1))).reshape(NPIX)        # (324,)
    xp = jnp.pad(xp, (0, NLANE - NPIX))                          # (384,)
    xb = jnp.broadcast_to(xp[None, :], (C_OUT, NLANE))           # (3, 384)

    # Pack weight + bias into one tiny operand (one DMA instead of two).
    wb = jnp.concatenate(
        [w.reshape(C_OUT, 1), b.reshape(C_OUT, 1)], axis=1
    ).astype(x.dtype)                                            # (3, 2)

    out_flat = pl.pallas_call(
        conv1x1_gelu_kernel,
        out_shape=jax.ShapeDtypeStruct((C_OUT, NLANE), x.dtype),
        in_specs=[
            pl.BlockSpec(memory_space=pltpu.MemorySpace.VMEM),   # x, broadcast
            pl.BlockSpec(memory_space=pltpu.MemorySpace.VMEM),   # packed w|b
        ],
        out_specs=pl.BlockSpec(memory_space=pltpu.MemorySpace.VMEM),
    )(xb, wb)

    # Drop the lane padding, then a free contiguous reshape back to NCHW.
    return out_flat[:, :NPIX].reshape(1, C_OUT, HP, WP)


if __name__ == "__main__":
    key = jax.random.PRNGKey(0)
    kx, kw, kb = jax.random.split(key, 3)

    # Conv2d(1, 3, 1): weight (3,1,1,1), bias (3,); default init bound = 1.0.
    x = jax.random.normal(kx, (1, 1, H, W), dtype=jnp.float32)
    w = jax.random.uniform(kw, (C_OUT, 1, 1, 1), minval=-1.0, maxval=1.0,
                           dtype=jnp.float32)
    b = jax.random.uniform(kb, (C_OUT,), minval=-1.0, maxval=1.0,
                           dtype=jnp.float32)

    out = jax.jit(model_forward)(x, w, b)
    jax.block_until_ready(out)

    assert out.shape == (1, C_OUT, HP, WP), out.shape
    assert out.dtype == jnp.float32

    # Pure-JAX reference of the original op chain (v1 ... v7).
    xp = jnp.pad(x[0, 0], ((1, 1), (1, 1)))
    v1 = xp[None] * w.reshape(C_OUT, 1, 1) + b.reshape(C_OUT, 1, 1)
    v2 = v1 * 0.5
    v3 = v1 * SQRT_HALF
    v4 = jax.lax.erf(v3)
    v5 = v4 + 1.0
    v6 = v2 * v5
    ref = v1 + v6
    assert jnp.allclose(out[0], ref, atol=1e-5, rtol=1e-5)

    print("KERNEL_OK")
</pallas_src>

<mosaic_0001>
module attributes {stable_mosaic.version = 11 : i64} {
  func.func @conv1x1_gelu_kernel(%arg0: memref<3x384xf32, #tpu.memory_space<vmem>>, %arg1: memref<3x2xf32, #tpu.memory_space<vmem>>, %arg2: memref<3x384xf32, #tpu.memory_space<vmem>>) attributes {dimension_semantics = [], scalar_prefetch = 0 : i64, scratch_operands = 0 : i64, tpu.core_type = #tpu.core_type<tc>} {
    %c0 = arith.constant 0 : index
    %c0_0 = arith.constant 0 : index
    %0 = vector.load %arg0[%c0, %c0_0] : memref<3x384xf32, #tpu.memory_space<vmem>>, vector<3x384xf32>
    %c0_1 = arith.constant 0 : index
    %c0_2 = arith.constant 0 : index
    %1 = vector.load %arg1[%c0_1, %c0_2] : memref<3x2xf32, #tpu.memory_space<vmem>>, vector<3x1xf32>
    %c0_3 = arith.constant 0 : index
    %c1 = arith.constant 1 : index
    %2 = vector.load %arg1[%c0_3, %c1] : memref<3x2xf32, #tpu.memory_space<vmem>>, vector<3x1xf32>
    %3 = vector.broadcast %1 : vector<3x1xf32> to vector<3x384xf32>
    %4 = arith.mulf %0, %3 : vector<3x384xf32>
    %5 = vector.broadcast %2 : vector<3x1xf32> to vector<3x384xf32>
    %6 = arith.addf %4, %5 : vector<3x384xf32>
    %cst = arith.constant 0.707106769 : f32
    %7 = vector.broadcast %cst : f32 to vector<3x384xf32>
    %8 = arith.mulf %6, %7 : vector<3x384xf32>
    %9 = math.erf %8 : vector<3x384xf32>
    %cst_4 = arith.constant 5.000000e-01 : f32
    %10 = vector.broadcast %cst_4 : f32 to vector<3x384xf32>
    %11 = arith.mulf %10, %9 : vector<3x384xf32>
    %cst_5 = arith.constant 1.500000e+00 : f32
    %12 = vector.broadcast %cst_5 : f32 to vector<3x384xf32>
    %13 = arith.addf %12, %11 : vector<3x384xf32>
    %14 = arith.mulf %6, %13 : vector<3x384xf32>
    %c0_6 = arith.constant 0 : index
    %c0_7 = arith.constant 0 : index
    %15 = vector.load %arg2[%c0_6, %c0_7] : memref<3x384xf32, #tpu.memory_space<vmem>>, vector<3x384xf32>
    tpu.vector_store %arg2[%c0_6, %c0_7], %14 {strides = array<i32>} : memref<3x384xf32, #tpu.memory_space<vmem>>, vector<3x384xf32>,
    return
  }
}

</mosaic_0001>

<bundles_post_ra>
// kernel: model_forward.1
= control target key start
LH: loop header
LB: loop body
LE: loop exit
PB: predicated region body
PF: predicated region fallthrough
CT: control target
= control target key end

     0   :  { %v66_v0 = vmov 0   ;;  %v67_v2 = vmov 1   ;;  %v68_v3 = vmov 839922192   ;;  %v21_v5 = vlaneseq  ;;  %s99_s1 = inlined_call_operand.vmem [shape: f32[3,2], index: 1, kind: input, shape index: {}]   ;;  %s100_s0 = inlined_call_operand.vmem [shape: f32[3,384], index: 0, kind: input, shape index: {}]   ;;  %s101_s2 = inlined_call_operand.vmem [shape: f32[3,384], index: 2, kind: output, shape index: {}]  }
   0x1   :  { %60 = vset.pattern.permute.xlu0 %v66_v0  ;;  %v13_v1 = vld [vmem:[%s99_s1] sm:$0x7]  ;;  %v19_v4 = vunpack.c.l.s4 %v68_v3  ;;  %v12_v12 = vld [vmem:[%s100_s0 + $0x8] sm:$0x7] }
   0x2   :  { %16 = vperm.xlu0 %60, %v13_v1   ;;  %v22_v7 = vshrl.u32 %v21_v5, 7  ;;  %v11_v11 = vld [vmem:[%s100_s0] sm:$0x77] }
   0x3   :  { %v20_v6 = vunpack.c.0.s8 %v19_v4 }
   0x5   :  { %v23_v8 = vsub.s32 %v20_v6, %v22_v7 }
   0x6   :  { %61 = vset.pattern.permute.xlu0 %v67_v2 }
   0x7   :  { %29 = vperm.xlu0 %61, %v13_v1  }
  0x81   :  { %v17_v9 = vpop.permute.xlu0 %16 }
  0x82   :  { %v24_v10 = vrot.slane %v17_v9, %v23_v8 }
  0x84   :  { %v26_v14 = vmul.f32 %v24_v10, %v11_v11  ;;  %v27_v15 = vmul.f32 %v24_v10, %v12_v12 }
  0x86   :  { %v30_v13 = vpop.permute.xlu0 %29 }
  0x87   :  { %v37_v16 = vrot.slane %v30_v13, %v23_v8 }
  0x89   :  { %v39_v17 = vadd.f32 %v37_v16, %v26_v14  ;;  %v40_v18 = vadd.f32 %v37_v16, %v27_v15 }
  0x8b   :  { %v41_v19 = vmul.f32 0.70710677, %v39_v17  ;;  %v42_v20 = vmul.f32 0.70710677, %v40_v18 }
  0x8d   :  { %62 = verf.f32 %v41_v19 }
  0x8e   :  { %64 = verf.f32 %v42_v20 }
  0x97   :  { %v63_v21 = vpop.eup %62 }
  0x98   :  { %v65_v22 = vpop.eup %64  ;;  %v45_v23 = vmul.f32 0.5, %v63_v21 }
  0x99   :  { %v46_v24 = vmul.f32 0.5, %v65_v22 }
  0x9a   :  { %v47_v25 = vadd.f32 1.5, %v45_v23 }
  0x9b   :  { %v48_v26 = vadd.f32 1.5, %v46_v24 }
  0x9c   :  { %v49_v27 = vmul.f32 %v47_v25, %v39_v17 }
  0x9d   :  { %v50_v28 = vmul.f32 %v48_v26, %v40_v18 }
  0x9e   :  { %51 = vst [vmem:[%s101_s2] sm:$0x77] %v49_v27 }
  0x9f   :  { %52 = vst [vmem:[%s101_s2 + $0x8] sm:$0x7] %v50_v28 }

</bundles_post_ra>
